<compile_context>
chip_gen: v7x
topology: tpu7x:2x2x1
jax: 0.10.0
libtpu: 0.0.40
codegen_flags: <defaults>
</compile_context>

<pallas_src>
import functools

import jax
import jax.numpy as jnp
from jax.experimental import pallas as pl
from jax.experimental.pallas import tpu as pltpu


def _vmem_capacity_bytes():
    """Per-core VMEM capacity; conservative 64 MiB fallback (v7x per-TC)."""
    try:
        return int(pltpu.get_tpu_info().vmem_capacity_bytes)
    except Exception:
        return 64 * 1024 * 1024


def _round_up(v, m):
    return ((v + m - 1) // m) * m


def _vmem_bytes(tm, tk, F, adj_bytes, x_bytes, mm_bytes):
    """Conservative VMEM footprint of one grid step (lane-padded, double-buffered)."""
    Fp = _round_up(F, 128)
    tkp = _round_up(tk, 128)
    return (2 * tm * tkp * adj_bytes      # adj tile (dominant stream)
            + 2 * tk * Fp * mm_bytes      # matmul rhs (x in adj dtype)
            + 2 * tm * Fp * x_bytes       # residual x rows
            + 2 * tm * Fp * x_bytes       # output tile
            + 2 * tm * 128 * 4            # diagonal-vector tile (lane padded)
            + tm * Fp * 4)                # f32 accumulator scratch


def _pick_tiles(N, F, adj_bytes, x_bytes, mm_bytes, budget):
    """Pick (tm, tk). Both divide N; tk is 128-aligned (adj lane dim) or N."""
    if N % 8 != 0:
        return N, N                                  # full-array blocks, legal for any N
    pref_align = 8 * max(1, 4 // adj_bytes)          # 8 f32 / 16 bf16 / 32 int8-fp8 packing
    align = pref_align if N % pref_align == 0 else 8

    # Contraction-tile candidates: keep x resident (tk = N) if it fits, otherwise
    # multiples of 128 dividing N, descending.
    tk_candidates = [N]
    if N % 128 == 0:
        t = N - 128
        while t >= 128:
            if N % t == 0:
                tk_candidates.append(t)
            t -= 128

    for tk in tk_candidates:
        fitting = [t for t in range(align, N + 1, align)
                   if N % t == 0
                   and _vmem_bytes(t, tk, F, adj_bytes, x_bytes, mm_bytes) <= budget]
        if not fitting:
            continue
        # Prefer >= 4 row-grid steps (megacore sharding + DMA/compute overlap), then >= 2.
        for min_steps in (4, 2, 1):
            cands = [t for t in fitting if N // t >= min_steps]
            if cands:
                return max(cands), tk
    # Nothing fits the budget even at the smallest tiles: still return something legal.
    return align, (128 if N % 128 == 0 else N)


def _diffusion_kernel(adj_ref, dvec_ref, xrows_ref, xmm_ref, o_ref, acc_ref, *, step):
    k = pl.program_id(1)

    @pl.when(k == 0)
    def _():
        acc_ref[...] = jnp.zeros_like(acc_ref)

    # (tm, tk) @ (tk, F) on the MXU with f32 accumulation.
    acc_ref[...] += jnp.dot(adj_ref[...], xmm_ref[...],
                            preferred_element_type=jnp.float32)

    @pl.when(k == pl.num_programs(1) - 1)
    def _():
        x_rows = xrows_ref[...].astype(jnp.float32)
        # L @ x = d * x_rows - adj @ x   (d broadcast over the feature axis)
        lx = dvec_ref[...] * x_rows - acc_ref[...]
        o_ref[...] = (x_rows - step * lx).astype(o_ref.dtype)


def diffusion_layer(x, adj, diagonal, step, *, tm=None, tk=None):
    """Pallas TPU forward of DiffusionLayer: x - step * (diagonal - adj) @ x.

    x: (N, F).  adj: (N, N).  diagonal: (N, N) diagonal (degree) matrix or (N,) vector.
    Contract: off-diagonal entries of `diagonal` must be zero — it is collapsed to its
    diagonal vector and never streamed as an (N, N) matrix.

    step: Python float hyperparameter (baked into the kernel).
    For best performance pre-cast adj to bf16 ONCE outside the per-step loop; the
    matmul rhs follows adj's dtype, the residual/output stay in x.dtype.
    """
    N, F = x.shape
    assert adj.shape == (N, N)

    if diagonal.ndim == 2:
        assert diagonal.shape == (N, N)
        dvec = jnp.diagonal(diagonal)
    else:
        assert diagonal.shape == (N,)
        dvec = diagonal
    dvec = dvec.reshape(N, 1).astype(jnp.float32)

    # MXU operand dtypes follow adj; cast x once here (hoisted out of the grid loop).
    mm_dtype = adj.dtype
    x_mm = x if x.dtype == mm_dtype else x.astype(mm_dtype)

    adj_bytes = adj.dtype.itemsize
    mm_bytes = x_mm.dtype.itemsize
    x_bytes = x.dtype.itemsize

    # Generation-aware VMEM budgeting (128 MiB v5e/v6e, 64 MiB per-TC v7x).
    cap = _vmem_capacity_bytes()
    vmem_limit = int(0.75 * cap)          # ~96 MiB on v5e/v6e, ~48 MiB on v7x
    tile_budget = int(0.85 * vmem_limit)  # ~81 MiB / ~40 MiB, leaves compiler headroom

    auto_tm, auto_tk = _pick_tiles(N, F, adj_bytes, x_bytes, mm_bytes, tile_budget)
    tm = auto_tm if tm is None else tm
    tk = auto_tk if tk is None else tk
    assert N % tm == 0 and (tm == N or tm % 8 == 0), "tm must divide N and be 8-aligned"
    assert N % tk == 0 and (tk == N or tk % 128 == 0), "tk must divide N and be 128-aligned"

    grid = (N // tm, N // tk)
    kernel = functools.partial(_diffusion_kernel, step=float(step))

    flops = 2 * N * N * F
    xmm_reads = (N // tm) * N * F * mm_bytes if grid[1] > 1 else N * F * mm_bytes
    bytes_accessed = N * N * adj_bytes + xmm_reads + 2 * N * F * x_bytes + N * 4

    return pl.pallas_call(
        kernel,
        out_shape=jax.ShapeDtypeStruct((N, F), x.dtype),
        grid_spec=pltpu.PrefetchScalarGridSpec(
            num_scalar_prefetch=0,
            grid=grid,
            in_specs=[
                pl.BlockSpec((tm, tk), lambda i, k: (i, k)),   # adj tile (dominant stream)
                pl.BlockSpec((tm, 1), lambda i, k: (i, 0)),    # diagonal vector rows (f32)
                pl.BlockSpec((tm, F), lambda i, k: (i, 0)),    # residual x rows (x dtype)
                pl.BlockSpec((tk, F), lambda i, k: (k, 0)),    # matmul rhs (adj dtype);
                                                               # constant block when tk == N
            ],
            out_specs=pl.BlockSpec((tm, F), lambda i, k: (i, 0)),
            scratch_shapes=[pltpu.VMEM((tm, F), jnp.float32)],
        ),
        compiler_params=pltpu.CompilerParams(
            dimension_semantics=("parallel", "arbitrary"),
            vmem_limit_bytes=vmem_limit,
        ),
        cost_estimate=pl.CostEstimate(
            flops=flops, transcendentals=0, bytes_accessed=bytes_accessed),
    )(adj, dvec, x, x_mm)


def diffusion_layer_ref(x, adj, diagonal, step):
    # precision="highest" matches torch's full-precision f32 matmul semantics.
    return x - step * jnp.matmul(diagonal - adj, x, precision=jax.lax.Precision.HIGHEST)


if __name__ == "__main__":
    key = jax.random.PRNGKey(0)
    k1, k2 = jax.random.split(key, 2)

    N, F = 256, 32
    step = 0.1

    x = jax.random.normal(k1, (N, F), dtype=jnp.float32)
    adj = jax.random.uniform(k2, (N, N), dtype=jnp.float32)
    adj = 0.5 * (adj + adj.T)                       # symmetric adjacency
    diagonal = jnp.diag(jnp.sum(adj, axis=-1))      # degree (diagonal) matrix

    # Contract check for the diagonal->vector collapse (off-diagonal must be zero).
    assert float(jnp.abs(diagonal - jnp.diag(jnp.diagonal(diagonal))).max()) == 0.0

    ref = diffusion_layer_ref(x, adj, diagonal, step)

    # f32 path, auto tile selection (grid keeps >= 4 row steps).
    out = jax.block_until_ready(diffusion_layer(x, adj, diagonal, step))
    assert out.shape == ref.shape
    assert jnp.allclose(out, ref, atol=1e-3, rtol=1e-3), "f32 mismatch vs reference"

    # bf16 adj (recommended production mode): cast ONCE outside the per-step loop.
    adj_bf16 = adj.astype(jnp.bfloat16)
    out_bf16 = jax.block_until_ready(diffusion_layer(x, adj_bf16, diagonal, step))
    assert jnp.allclose(out_bf16, ref, atol=0.2, rtol=5e-2), "bf16 mismatch vs reference"

    # Explicit small tiles to exercise the k-tiled (accumulator) path.
    out_kt = jax.block_until_ready(diffusion_layer(x, adj, diagonal, step, tm=64, tk=128))
    assert jnp.allclose(out_kt, ref, atol=1e-3, rtol=1e-3), "k-tiled mismatch vs reference"

    print("KERNEL_OK")
</pallas_src>

<mosaic_0001>
module attributes {stable_mosaic.version = 11 : i64} {
  func.func @_diffusion_kernel(%arg0: i32, %arg1: i32, %arg2: memref<64x256xf32, #tpu.memory_space<vmem>>, %arg3: memref<64x1xf32, #tpu.memory_space<vmem>>, %arg4: memref<64x32xf32, #tpu.memory_space<vmem>>, %arg5: memref<256x32xf32, #tpu.memory_space<vmem>>, %arg6: memref<64x32xf32, #tpu.memory_space<vmem>>, %arg7: memref<64x32xf32, #tpu.memory_space<vmem>>) attributes {dimension_semantics = [#tpu.dimension_semantics<parallel>, #tpu.dimension_semantics<arbitrary>], iteration_bounds = array<i64: 4, 1>, scalar_prefetch = 0 : i64, scratch_operands = 1 : i64, tpu.core_type = #tpu.core_type<tc>, window_params = [{transform_indices = @transform_0, window_bounds = array<i64: 64, 256>}, {transform_indices = @transform_1, window_bounds = array<i64: 64, 1>}, {transform_indices = @transform_2, window_bounds = array<i64: 64, 32>}, {transform_indices = @transform_3, window_bounds = array<i64: 256, 32>}, {transform_indices = @transform_4, window_bounds = array<i64: 64, 32>}]} {
    %c0_i32 = arith.constant 0 : i32
    %0 = arith.cmpi eq, %arg1, %c0_i32 : i32
    %1 = arith.extui %0 : i1 to i32
    %c0_i32_0 = arith.constant 0 : i32
    %2 = arith.cmpi ne, %1, %c0_i32_0 : i32
    scf.if %2 {
      %cst_10 = arith.constant 0.000000e+00 : f32
      %12 = vector.broadcast %cst_10 : f32 to vector<64x32xf32>
      %c0_11 = arith.constant 0 : index
      %c0_12 = arith.constant 0 : index
      %13 = vector.load %arg7[%c0_11, %c0_12] : memref<64x32xf32, #tpu.memory_space<vmem>>, vector<64x32xf32>
      tpu.vector_store %arg7[%c0_11, %c0_12], %12 {strides = array<i32>} : memref<64x32xf32, #tpu.memory_space<vmem>>, vector<64x32xf32>,
    } else {
    }
    %c0 = arith.constant 0 : index
    %c0_1 = arith.constant 0 : index
    %3 = vector.load %arg7[%c0, %c0_1] : memref<64x32xf32, #tpu.memory_space<vmem>>, vector<64x32xf32>
    %c0_2 = arith.constant 0 : index
    %c0_3 = arith.constant 0 : index
    %4 = vector.load %arg2[%c0_2, %c0_3] : memref<64x256xf32, #tpu.memory_space<vmem>>, vector<64x256xf32>
    %c0_4 = arith.constant 0 : index
    %c0_5 = arith.constant 0 : index
    %5 = vector.load %arg5[%c0_4, %c0_5] : memref<256x32xf32, #tpu.memory_space<vmem>>, vector<256x32xf32>
    %cst = arith.constant dense<0.000000e+00> : vector<64x32xf32>
    %6 = tpu.matmul %4, %5, %cst {dimension_numbers = #tpu.dot_dimension_numbers<[1], [0], [0], [1], [0, 0, 1, 1], [], []>} : vector<64x256xf32>, vector<256x32xf32>, vector<64x32xf32> -> vector<64x32xf32>
    %7 = arith.addf %3, %6 : vector<64x32xf32>
    %c0_6 = arith.constant 0 : index
    %c0_7 = arith.constant 0 : index
    %8 = vector.load %arg7[%c0_6, %c0_7] : memref<64x32xf32, #tpu.memory_space<vmem>>, vector<64x32xf32>
    tpu.vector_store %arg7[%c0_6, %c0_7], %7 {strides = array<i32>} : memref<64x32xf32, #tpu.memory_space<vmem>>, vector<64x32xf32>,
    %c0_i32_8 = arith.constant 0 : i32
    %9 = arith.cmpi eq, %arg1, %c0_i32_8 : i32
    %10 = arith.extui %9 : i1 to i32
    %c0_i32_9 = arith.constant 0 : i32
    %11 = arith.cmpi ne, %10, %c0_i32_9 : i32
    scf.if %11 {
      %c0_10 = arith.constant 0 : index
      %c0_11 = arith.constant 0 : index
      %12 = vector.load %arg4[%c0_10, %c0_11] : memref<64x32xf32, #tpu.memory_space<vmem>>, vector<64x32xf32>
      %c0_12 = arith.constant 0 : index
      %c0_13 = arith.constant 0 : index
      %13 = vector.load %arg3[%c0_12, %c0_13] : memref<64x1xf32, #tpu.memory_space<vmem>>, vector<64x1xf32>
      %14 = vector.broadcast %13 : vector<64x1xf32> to vector<64x32xf32>
      %15 = arith.mulf %14, %12 : vector<64x32xf32>
      %c0_14 = arith.constant 0 : index
      %c0_15 = arith.constant 0 : index
      %16 = vector.load %arg7[%c0_14, %c0_15] : memref<64x32xf32, #tpu.memory_space<vmem>>, vector<64x32xf32>
      %17 = arith.subf %15, %16 : vector<64x32xf32>
      %cst_16 = arith.constant 1.000000e-01 : f32
      %18 = vector.broadcast %cst_16 : f32 to vector<64x32xf32>
      %19 = arith.mulf %18, %17 : vector<64x32xf32>
      %20 = arith.subf %12, %19 : vector<64x32xf32>
      %c0_17 = arith.constant 0 : index
      %c0_18 = arith.constant 0 : index
      %21 = vector.load %arg6[%c0_17, %c0_18] : memref<64x32xf32, #tpu.memory_space<vmem>>, vector<64x32xf32>
      tpu.vector_store %arg6[%c0_17, %c0_18], %20 {strides = array<i32>} : memref<64x32xf32, #tpu.memory_space<vmem>>, vector<64x32xf32>,
    } else {
    }
    return
  }
  func.func @transform_0(%arg0: i32, %arg1: i32) -> (i32, i32) {
    %c0_i32 = arith.constant 0 : i32
    return %arg0, %arg1 : i32, i32
  }
  func.func @transform_1(%arg0: i32, %arg1: i32) -> (i32, i32) {
    %c0_i32 = arith.constant 0 : i32
    %c0_i32_0 = arith.constant 0 : i32
    return %arg0, %c0_i32 : i32, i32
  }
  func.func @transform_2(%arg0: i32, %arg1: i32) -> (i32, i32) {
    %c0_i32 = arith.constant 0 : i32
    %c0_i32_0 = arith.constant 0 : i32
    return %arg0, %c0_i32 : i32, i32
  }
  func.func @transform_3(%arg0: i32, %arg1: i32) -> (i32, i32) {
    %c0_i32 = arith.constant 0 : i32
    %c0_i32_0 = arith.constant 0 : i32
    return %arg1, %c0_i32 : i32, i32
  }
  func.func @transform_4(%arg0: i32, %arg1: i32) -> (i32, i32) {
    %c0_i32 = arith.constant 0 : i32
    %c0_i32_0 = arith.constant 0 : i32
    return %arg0, %c0_i32 : i32, i32
  }
}

</mosaic_0001>

<bundles_post_ra>
// kernel: tpu_custom_call.1
= control target key start
LH: loop header
LB: loop body
LE: loop exit
PB: predicated region body
PF: predicated region fallthrough
CT: control target
= control target key end

     0   :  { %s907_s15 = smov 0   ;;  %s909_s16 = smov 0   ;;  %s1128_s0 = inlined_call_operand.vmem [shape: f32[256,256], index: 0, kind: input, shape index: {}]   ;;  %s1129_s1 = inlined_call_operand.vmem [shape: f32[256,1], index: 1, kind: input, shape index: {}]   ;;  %s1130_s2 = inlined_call_operand.vmem [shape: f32[256,32], index: 2, kind: input, shape index: {}]   ;;  %s1131_s3 = inlined_call_operand.vmem [shape: f32[256,32], index: 3, kind: input, shape index: {}]   ;;  %s1132_s4 = inlined_call_operand.vmem [shape: f32[256,32], index: 4, kind: output, shape index: {}]  }
   0x1   :  { %s911_s17 = smov 0  }
   0x2 LB: > { %s26_s18 = sadd.s32 1, %s874_s16  ;;  %p711_p0 = scmp.ge.s32.totalorder %s878_s17, 1  ;;  %s878_s17 = sphi %s911_s17, %s14_s17   ;;  %s874_s16 = sphi %s909_s16, %s1134_s16   ;;  %s870_s15 = sphi %s907_s15, %s1133_s15  }
   0x3   : > { %p28_p1 = scmp.ge.s32.totalorder %s26_s18, 4  ;;  %p216_p2 = scmp.lt.s32.totalorder %s878_s17, 5 }
   0x5   : > { %s1136_s18 = smov (%p28_p1, %s26_s18), 0  ;;  %p217_p3 = pnand %p711_p0, %p216_p2 }
   0x6   : > { %v351_v0 = vld [vmem:[%s1131_s3 + $0x80] sm:$0xff] (!%p217_p3)  ;;  %v352_v1 = vld [vmem:[%s1131_s3 + $0x88] sm:$0xff] (!%p217_p3)  ;;  %s712_s25 = sshll.u32 (!%p217_p3), %s870_s15, 3  ;;  %v353_v5 = vld [vmem:[%s1131_s3 + $0x90] sm:$0xff] (!%p217_p3)  ;;  %v880_v7 = vmov (!%p217_p3), 0   ;;  %vm302_vm0 = vcmask (!%p217_p3), 261120  }
   0x7   : > { %220 = sbr.rel (%p217_p3) target bundleno = 286 (0x11e), region = 36  ;;  %v335_v2 = vld [vmem:[%s1131_s3] sm:$0xff] (!%p217_p3)  ;;  %v780_v3 = vpack.c.bf16 (!%p217_p3), %v352_v1, %v351_v0  ;;  %v336_v4 = vld [vmem:[%s1131_s3 + $0x8] sm:$0xff] (!%p217_p3)  ;;  %v354_v6 = vld [vmem:[%s1131_s3 + $0x98] sm:$0xff] (!%p217_p3)  ;;  %p264_p4 = scmp.lt.s32.totalorder (!%p217_p3), %s712_s25, 31  ;;  %855 = vset.pattern.permute.xlu1 (!%p217_p3), %v880_v7  ;;  %854 = vset.pattern.permute.xlu0 (!%p217_p3), %v880_v7 }
   0x8   : > { %v782_v8 = vpack.c.bf16 (!%p217_p3), %v336_v4, %v335_v2  ;;  %v784_v9 = vpack.c.bf16 (!%p217_p3), %v354_v6, %v353_v5  ;;  %v337_v10 = vld [vmem:[%s1131_s3 + $0x10] sm:$0xff] (!%p217_p3)  ;;  %v338_v11 = vld [vmem:[%s1131_s3 + $0x18] sm:$0xff] (!%p217_p3)  ;;  %v355_v12 = vld [vmem:[%s1131_s3 + $0xa0] sm:$0xff] (!%p217_p3) }
   0x9   : > { %781 = vmatprep.subr.bf16.mxu0 (!%p217_p3), %v780_v3  ;;  %812 = vmatprep.subr.bf16.mxu1 (!%p217_p3), %v780_v3  ;;  %v356_v13 = vld [vmem:[%s1131_s3 + $0xa8] sm:$0xff] (!%p217_p3)  ;;  %v786_v14 = vpack.c.bf16 (!%p217_p3), %v338_v11, %v337_v10  ;;  %v339_v16 = vld [vmem:[%s1131_s3 + $0x20] sm:$0xff] (!%p217_p3)  ;;  %v357_v18 = vld [vmem:[%s1131_s3 + $0xb0] sm:$0xff] (!%p217_p3) }
   0xa   : > { %783 = vmatpush3.bf16.msra.mxu0 (!%p217_p3), %v782_v8  ;;  %820 = vmatpush3.bf16.msra.mxu1 (!%p217_p3), %v782_v8  ;;  %v788_v15 = vpack.c.bf16 (!%p217_p3), %v356_v13, %v355_v12  ;;  %v340_v17 = vld [vmem:[%s1131_s3 + $0x28] sm:$0xff] (!%p217_p3)  ;;  %v358_v19 = vld [vmem:[%s1131_s3 + $0xb8] sm:$0xff] (!%p217_p3)  ;;  %v341_v22 = vld [vmem:[%s1131_s3 + $0x30] sm:$0xff] (!%p217_p3) }
   0xb   : > { %785 = vmatprep.subr.bf16.mxu0 (!%p217_p3), %v784_v9  ;;  %813 = vmatprep.subr.bf16.mxu1 (!%p217_p3), %v784_v9  ;;  %v790_v20 = vpack.c.bf16 (!%p217_p3), %v340_v17, %v339_v16  ;;  %v792_v21 = vpack.c.bf16 (!%p217_p3), %v358_v19, %v357_v18  ;;  %v342_v23 = vld [vmem:[%s1131_s3 + $0x38] sm:$0xff] (!%p217_p3)  ;;  %v359_v24 = vld [vmem:[%s1131_s3 + $0xc0] sm:$0xff] (!%p217_p3)  ;;  %v360_v25 = vld [vmem:[%s1131_s3 + $0xc8] sm:$0xff] (!%p217_p3)  ;;  %v881_v9 = vmov (!%p217_p3), 0.0  }
   0xc   : > { %v794_v28 = vpack.c.bf16 (!%p217_p3), %v342_v23, %v341_v22  ;;  %v796_v29 = vpack.c.bf16 (!%p217_p3), %v360_v25, %v359_v24  ;;  %v343_v30 = vld [vmem:[%s1131_s3 + $0x40] sm:$0xff] (!%p217_p3)  ;;  %v344_v31 = vld [vmem:[%s1131_s3 + $0x48] sm:$0xff] (!%p217_p3)  ;;  %v361_v32 = vld [vmem:[%s1131_s3 + $0xd0] sm:$0xff] (!%p217_p3)  ;;  %303 = vst.msk [vmem:[#allocation2] sm:$0xff] (!%p217_p3), %vm302_vm0, %v881_v9 }
   0xd   : > { %v362_v33 = vld [vmem:[%s1131_s3 + $0xd8] sm:$0xff] (!%p217_p3)  ;;  %v798_v34 = vpack.c.bf16 (!%p217_p3), %v344_v31, %v343_v30  ;;  %v345_v38 = vld [vmem:[%s1131_s3 + $0x50] sm:$0xff] (!%p217_p3)  ;;  %v363_v40 = vld [vmem:[%s1131_s3 + $0xe0] sm:$0xff] (!%p217_p3)  ;;  %304 = vst.msk [vmem:[#allocation2 + $0x8] sm:$0xff] (!%p217_p3), %vm302_vm0, %v881_v9 }
   0xe   : > { %s1138_s25 = smov (!%p264_p4, %s712_s25), 31  ;;  %787 = vmatpush3.bf16.msra.mxu0 %v786_v14  ;;  %821 = vmatpush3.bf16.msra.mxu1 %v786_v14  ;;  %v800_v37 = vpack.c.bf16 %v362_v33, %v361_v32  ;;  %v346_v39 = vld [vmem:[%s1131_s3 + $0x58] sm:$0xff]  ;;  %v364_v41 = vld [vmem:[%s1131_s3 + $0xe8] sm:$0xff]  ;;  %v347_v46 = vld [vmem:[%s1131_s3 + $0x60] sm:$0xff]  ;;  %305 = vst.msk [vmem:[#allocation2 + $0x10] sm:$0xff] %vm302_vm0, %v881_v9 }
   0xf   : > { %s723_s21 = sshll.u32 %s1138_s25, 4  ;;  %789 = vmatprep.subr.bf16.mxu0 %v788_v15  ;;  %814 = vmatprep.subr.bf16.mxu1 %v788_v15  ;;  %s988_s12 = sshll.u32 %s1138_s25, 3  ;;  %v802_v44 = vpack.c.bf16 %v346_v39, %v345_v38  ;;  %v804_v45 = vpack.c.bf16 %v364_v41, %v363_v40  ;;  %v348_v47 = vld [vmem:[%s1131_s3 + $0x68] sm:$0xff]  ;;  %v365_v48 = vld [vmem:[%s1131_s3 + $0xf0] sm:$0xff]  ;;  %v366_v49 = vld [vmem:[%s1131_s3 + $0xf8] sm:$0xff]  ;;  %306 = vst.msk [vmem:[#allocation2 + $0x18] sm:$0xff] %vm302_vm0, %v881_v9 }
  0x10   : > { %s973_s29 = scalar_lea.vmem %s1128_s0, %s723_s21  ;;  %s1001_s21 = scalar_lea.vmem %s1129_s1, %s988_s12  ;;  %v806_v52 = vpack.c.bf16 %v348_v47, %v347_v46  ;;  %v808_v53 = vpack.c.bf16 %v366_v49, %v365_v48  ;;  %v349_v54 = vld [vmem:[%s1131_s3 + $0x70] sm:$0xff]  ;;  %v350_v55 = vld [vmem:[%s1131_s3 + $0x78] sm:$0xff]  ;;  %307 = vst.msk [vmem:[#allocation2 + $0x20] sm:$0xff] %vm302_vm0, %v881_v9  ;;  %308 = vst.msk [vmem:[#allocation2 + $0x28] sm:$0xff] %vm302_vm0, %v881_v9 }
  0x11   : > { %v320_v26 = vld [vmem:[%s973_s29 + $0x8] sm:$0xff]  ;;  %v502_v35 = vld [vmem:[%s1001_s21 + $0x10] sm:$0xff]  ;;  %v500_v36 = vld [vmem:[%s1001_s21] sm:$0xff]  ;;  %v810_v58 = vpack.c.bf16 %v350_v55, %v349_v54  ;;  %309 = vst.msk [vmem:[#allocation2 + $0x30] sm:$0xff] %vm302_vm0, %v881_v9  ;;  %s1075_s27 = scalar_lea.vmem %s1130_s2, %s988_s12  ;;  %s1094_s5 = scalar_lea.vmem %s1132_s4, %s988_s12 }
  0x12   : > { %431 = vmatprep.mubr.f32.mxu0 %v320_v26  ;;  %v328_v27 = vld [vmem:[%s973_s29 + $0x48] sm:$0xff]  ;;  %791 = vmatpush3.bf16.msra.mxu0 %v790_v20  ;;  %v503_v42 = vld [vmem:[%s1001_s21 + $0x18] sm:$0xff]  ;;  %v504_v51 = vld [vmem:[%s1001_s21 + $0x20] sm:$0xff]  ;;  %310 = vst.msk [vmem:[#allocation2 + $0x38] sm:$0xff] %vm302_vm0, %v881_v9 }
  0x13   : > { %822 = vmatpush3.bf16.msra.mxu1 %v790_v20  ;;  %793 = vmatprep.subr.bf16.mxu0 %v792_v21  ;;  %v501_v43 = vld [vmem:[%s1001_s21 + $0x8] sm:$0xff]  ;;  %v507_v56 = vld [vmem:[%s1001_s21 + $0x38] sm:$0xff]  ;;  %v506_v57 = vld [vmem:[%s1001_s21 + $0x30] sm:$0xff] }
  0x14   : > { %815 = vmatprep.subr.bf16.mxu1 %v792_v21  ;;  %451 = vmatprep.mubr.f32.mxu1 %v328_v27  ;;  %v505_v50 = vld [vmem:[%s1001_s21 + $0x28] sm:$0xff]  ;;  %v319_v59 = vld [vmem:[%s973_s29] sm:$0xff]  ;;  %v322_v61 = vld [vmem:[%s973_s29 + $0x18] sm:$0xff] }
  0x15   : > { %520 = vperm.xlu1 %855, %v502_v35   ;;  %510 = vperm.xlu0 %854, %v500_v36   ;;  %v327_v60 = vld [vmem:[%s973_s29 + $0x40] sm:$0xff]  ;;  %v330_v62 = vld [vmem:[%s973_s29 + $0x58] sm:$0xff]  ;;  %v321_v63 = vld [vmem:[%s973_s29 + $0x10] sm:$0xff] }
  0x16   : > { %795 = vmatpush3.bf16.msra.mxu0 %v794_v28  ;;  %v329_v0 = vld [vmem:[%s973_s29 + $0x50] sm:$0xff]  ;;  %v324_v1 = vld [vmem:[%s973_s29 + $0x28] sm:$0xff]  ;;  %v323_v3 = vld [vmem:[%s973_s29 + $0x20] sm:$0xff] }
  0x17   : > { %823 = vmatpush3.bf16.msra.mxu1 %v794_v28  ;;  %797 = vmatprep.subr.bf16.mxu0 %v796_v29  ;;  %v332_v2 = vld [vmem:[%s973_s29 + $0x68] sm:$0xff]  ;;  %v331_v4 = vld [vmem:[%s973_s29 + $0x60] sm:$0xff]  ;;  %v326_v5 = vld [vmem:[%s973_s29 + $0x38] sm:$0xff] }
  0x18   : > { %816 = vmatprep.subr.bf16.mxu1 %v796_v29  ;;  %v334_v6 = vld [vmem:[%s973_s29 + $0x78] sm:$0xff]  ;;  %v325_v7 = vld [vmem:[%s973_s29 + $0x30] sm:$0xff]  ;;  %v311_v15 = vld [vmem:[#allocation2] sm:$0xff] }
  0x19   : > { %525 = vperm.xlu1 %855, %v503_v42   ;;  %515 = vperm.xlu0 %854, %v501_v43   ;;  %v333_v8 = vld [vmem:[%s973_s29 + $0x70] sm:$0xff]  ;;  %v315_v17 = vld [vmem:[#allocation2 + $0x20] sm:$0xff]  ;;  %v312_v25 = vld [vmem:[#allocation2 + $0x8] sm:$0xff] }
  0x1a   : > { %799 = vmatpush3.bf16.msra.mxu0 %v798_v34  ;;  %v316_v27 = vld [vmem:[#allocation2 + $0x28] sm:$0xff]  ;;  %v492_v31 = vld [vmem:[%s1075_s27] sm:$0xff]  ;;  %v313_v39 = vld [vmem:[#allocation2 + $0x10] sm:$0xff] }
  0x1b   : > { %824 = vmatpush3.bf16.msra.mxu1 %v798_v34  ;;  %801 = vmatprep.subr.bf16.mxu0 %v800_v37  ;;  %v496_v33 = vld [vmem:[%s1075_s27 + $0x20] sm:$0xff]  ;;  %v317_v41 = vld [vmem:[#allocation2 + $0x30] sm:$0xff]  ;;  %v493_v47 = vld [vmem:[%s1075_s27 + $0x8] sm:$0xff] }
  0x1c   : > { %817 = vmatprep.subr.bf16.mxu1 %v800_v37  ;;  %v497_v48 = vld [vmem:[%s1075_s27 + $0x28] sm:$0xff]  ;;  %v498_v9 = vld [vmem:[%s1075_s27 + $0x30] sm:$0xff] }
  0x1d   : > { %535 = vperm.xlu1 %855, %v505_v50   ;;  %530 = vperm.xlu0 %854, %v504_v51  }
  0x1e   : > { %803 = vmatpush3.bf16.msra.mxu0 %v802_v44 }
  0x1f   : > { %825 = vmatpush3.bf16.msra.mxu1 %v802_v44  ;;  %805 = vmatprep.subr.bf16.mxu0 %v804_v45 }
  0x20   : > { %818 = vmatprep.subr.bf16.mxu1 %v804_v45 }
  0x21   : > { %545 = vperm.xlu1 %855, %v507_v56   ;;  %540 = vperm.xlu0 %854, %v506_v57   ;;  %v318_v57 = vld [vmem:[#allocation2 + $0x38] sm:$0xff] }
  0x22   : > { %807 = vmatpush3.bf16.msra.mxu0 %v806_v52 }
  0x23   : > { %826 = vmatpush3.bf16.msra.mxu1 %v806_v52  ;;  %809 = vmatprep.subr.bf16.mxu0 %v808_v53 }
  0x24   : > { %819 = vmatprep.subr.bf16.mxu1 %v808_v53  ;;  %v314_v53 = vld [vmem:[#allocation2 + $0x18] sm:$0xff] }
  0x26   : > { %811 = vmatpush3.bf16.msra.mxu0 %v810_v58 }
  0x27   : > { %827 = vmatpush3.bf16.msra.mxu1 %v810_v58 }
  0x29   : > { %432 = vmatmul.mubr.f32.vlgmr.msra.gmra.mrb[0].mxu0 %v319_v59 }
  0x2a   : > { %452 = vmatmul.mubr.f32.vlgmr.msra.gmra.mrb[0].mxu1 %v327_v60  ;;  %436 = vmatprep.mubr.f32.mxu0 %v322_v61 }
  0x2b   : > { %456 = vmatprep.mubr.f32.mxu1 %v330_v62 }
  0x2d   : > { %437 = vmatmul.mubr.f32.gmra.mrb[2].mxu0 %v321_v63 }
  0x2e   : > { %457 = vmatmul.mubr.f32.gmra.mrb[2].mxu1 %v329_v0  ;;  %441 = vmatprep.mubr.f32.mxu0 %v324_v1 }
  0x2f   : > { %461 = vmatprep.mubr.f32.mxu1 %v332_v2  ;;  %v494_v2 = vld [vmem:[%s1075_s27 + $0x10] sm:$0xff] }
  0x31   : > { %442 = vmatmul.mubr.f32.gmra.mrb[4].mxu0 %v323_v3 }
  0x32   : > { %462 = vmatmul.mubr.f32.gmra.mrb[4].mxu1 %v331_v4  ;;  %446 = vmatprep.mubr.f32.mxu0 %v326_v5 }
  0x33   : > { %466 = vmatprep.mubr.f32.mxu1 %v334_v6 }
  0x35   : > { %447 = vmatmul.mubr.f32.gmra.mrb[6].mxu0 %v325_v7 }
  0x36   : > { %467 = vmatmul.mubr.f32.gmra.mrb[6].mxu1 %v333_v8 }
  0x94   : > { %v511_v10 = vpop.permute.xlu0 %510  ;;  %v1069_v11 = vpop.permute.xlu1 %520 }
  0x95   : > { %v548_v43 = vmul.f32 %v511_v10, %v492_v31 }
  0x98   : > { %v516_v12 = vpop.permute.xlu0 %515  ;;  %v1080_v32 = vpop.permute.xlu1 %525 }
  0x99   : > { %v549_v0 = vmul.f32 %v516_v12, %v493_v47 }
  0x9c   : > { %v531_v34 = vpop.permute.xlu0 %530  ;;  %v536_v60 = vpop.permute.xlu1 %535 }
  0x9d   : > { %v552_v44 = vmul.f32 %v531_v34, %v496_v33  ;;  %v553_v1 = vmul.f32 %v536_v60, %v497_v48 }
  0xa0   : > { %v541_v10 = vpop.permute.xlu0 %540 }
  0xfc   : > { %v756_v13 = vpop.f32.mrb[0].mxu0 }
  0xfd   : > { %v768_v14 = vpop.f32.mrb[0].mxu1  ;;  %v757_v16 = vpop.f32.mrb[1].mxu0 }
  0xfe   : > { %v769_v18 = vpop.f32.mrb[1].mxu1  ;;  %v758_v19 = vadd.f32 %v757_v16, %v756_v13  ;;  %v550_v16 = vmul.f32 %v1069_v11, %v494_v2 }
  0xff   : > { %v770_v20 = vadd.f32 %v769_v18, %v768_v14 }
 0x100   : > { %v472_v21 = vadd.f32 %v758_v19, %v311_v15  ;;  %v759_v23 = vpop.f32.mrb[2].mxu0 }
 0x101   : > { %v476_v22 = vadd.f32 %v770_v20, %v315_v17  ;;  %v771_v24 = vpop.f32.mrb[2].mxu1  ;;  %v760_v26 = vpop.f32.mrb[3].mxu0  ;;  %v495_v17 = vld [vmem:[%s1075_s27 + $0x18] sm:$0xff]  ;;  %v554_v20 = vmul.f32 %v541_v10, %v498_v9 }
 0x102   : > { %v772_v28 = vpop.f32.mrb[3].mxu1  ;;  %481 = vst.msk [vmem:[#allocation2] sm:$0xff] %vm302_vm0, %v472_v21  ;;  %v761_v29 = vadd.f32 %v760_v26, %v759_v23  ;;  %v546_v23 = vpop.permute.xlu1 %545 }
 0x103   : > { %485 = vst.msk [vmem:[#allocation2 + $0x20] sm:$0xff] %vm302_vm0, %v476_v22  ;;  %v773_v30 = vadd.f32 %v772_v28, %v771_v24  ;;  %v499_v22 = vld [vmem:[%s1075_s27 + $0x38] sm:$0xff]  ;;  %v551_v28 = vmul.f32 %v1080_v32, %v495_v17 }
 0x104   : > { %v473_v35 = vadd.f32 %v761_v29, %v312_v25  ;;  %v762_v37 = vpop.f32.mrb[4].mxu0 }
 0x105   : > { %v477_v36 = vadd.f32 %v773_v30, %v316_v27  ;;  %v774_v38 = vpop.f32.mrb[4].mxu1  ;;  %v763_v40 = vpop.f32.mrb[5].mxu0  ;;  %v555_v30 = vmul.f32 %v546_v23, %v499_v22 }
 0x106   : > { %v775_v42 = vpop.f32.mrb[5].mxu1  ;;  %482 = vst.msk [vmem:[#allocation2 + $0x8] sm:$0xff] %vm302_vm0, %v473_v35  ;;  %v764_v45 = vadd.f32 %v763_v40, %v762_v37 }
 0x107   : > { %486 = vst.msk [vmem:[#allocation2 + $0x28] sm:$0xff] %vm302_vm0, %v477_v36  ;;  %v776_v46 = vadd.f32 %v775_v42, %v774_v38 }
 0x108   : > { %v474_v49 = vadd.f32 %v764_v45, %v313_v39  ;;  %v765_v51 = vpop.f32.mrb[6].mxu0 }
 0x109   : > { %v478_v50 = vadd.f32 %v776_v46, %v317_v41  ;;  %v777_v52 = vpop.f32.mrb[6].mxu1  ;;  %v556_v54 = vld [vmem:[#allocation2] sm:$0xff]  ;;  %v766_v56 = vpop.f32.mrb[7].mxu0 }
 0x10a   : > { %v560_v55 = vld [vmem:[#allocation2 + $0x20] sm:$0xff]  ;;  %v778_v58 = vpop.f32.mrb[7].mxu1  ;;  %v564_v59 = vsub.f32 %v548_v43, %v556_v54  ;;  %483 = vst.msk [vmem:[#allocation2 + $0x10] sm:$0xff] %vm302_vm0, %v474_v49  ;;  %v767_v62 = vadd.f32 %v766_v56, %v765_v51 }
 0x10b   : > { %v568_v61 = vsub.f32 %v552_v44, %v560_v55  ;;  %487 = vst.msk [vmem:[#allocation2 + $0x30] sm:$0xff] %vm302_vm0, %v478_v50  ;;  %v779_v63 = vadd.f32 %v778_v58, %v777_v52 }
 0x10c   : > { %v572_v3 = vmul.f32 0.1, %v564_v59  ;;  %v475_v5 = vadd.f32 %v767_v62, %v314_v53 }
 0x10d   : > { %v576_v4 = vmul.f32 0.1, %v568_v61  ;;  %v479_v6 = vadd.f32 %v779_v63, %v318_v57  ;;  %v557_v7 = vld [vmem:[#allocation2 + $0x8] sm:$0xff] }
 0x10e   : > { %v561_v8 = vld [vmem:[#allocation2 + $0x28] sm:$0xff]  ;;  %v580_v12 = vsub.f32 %v492_v31, %v572_v3  ;;  %v565_v13 = vsub.f32 %v549_v0, %v557_v7  ;;  %484 = vst.msk [vmem:[#allocation2 + $0x18] sm:$0xff] %vm302_vm0, %v475_v5 }
 0x10f   : > { %v569_v14 = vsub.f32 %v553_v1, %v561_v8  ;;  %v584_v15 = vsub.f32 %v496_v33, %v576_v4  ;;  %488 = vst.msk [vmem:[#allocation2 + $0x38] sm:$0xff] %vm302_vm0, %v479_v6 }
 0x110   : > { %588 = vst.msk [vmem:[%s1094_s5] sm:$0xff] %vm302_vm0, %v580_v12  ;;  %v573_v18 = vmul.f32 0.1, %v565_v13 }
 0x111   : > { %v577_v19 = vmul.f32 0.1, %v569_v14  ;;  %592 = vst.msk [vmem:[%s1094_s5 + $0x20] sm:$0xff] %vm302_vm0, %v584_v15  ;;  %v558_v21 = vld [vmem:[#allocation2 + $0x10] sm:$0xff] }
 0x112   : > { %v562_v24 = vld [vmem:[#allocation2 + $0x30] sm:$0xff]  ;;  %v581_v25 = vsub.f32 %v493_v47, %v573_v18  ;;  %v566_v27 = vsub.f32 %v550_v16, %v558_v21 }
 0x113   : > { %v585_v26 = vsub.f32 %v497_v48, %v577_v19  ;;  %v570_v11 = vsub.f32 %v554_v20, %v562_v24 }
 0x114   : > { %589 = vst.msk [vmem:[%s1094_s5 + $0x8] sm:$0xff] %vm302_vm0, %v581_v25  ;;  %v574_v29 = vmul.f32 0.1, %v566_v27 }
 0x115   : > { %593 = vst.msk [vmem:[%s1094_s5 + $0x28] sm:$0xff] %vm302_vm0, %v585_v26  ;;  %v578_v31 = vmul.f32 0.1, %v570_v11  ;;  %v559_v33 = vld [vmem:[#allocation2 + $0x18] sm:$0xff] }
 0x116   : > { %v563_v34 = vld [vmem:[#allocation2 + $0x38] sm:$0xff]  ;;  %v582_v35 = vsub.f32 %v494_v2, %v574_v29  ;;  %v567_v37 = vsub.f32 %v551_v28, %v559_v33 }
 0x117   : > { %v586_v36 = vsub.f32 %v498_v9, %v578_v31  ;;  %v571_v38 = vsub.f32 %v555_v30, %v563_v34 }
 0x118   : > { %590 = vst.msk [vmem:[%s1094_s5 + $0x10] sm:$0xff] %vm302_vm0, %v582_v35  ;;  %v575_v32 = vmul.f32 0.1, %v567_v37 }
 0x119   : > { %594 = vst.msk [vmem:[%s1094_s5 + $0x30] sm:$0xff] %vm302_vm0, %v586_v36  ;;  %v579_v39 = vmul.f32 0.1, %v571_v38 }
 0x11a   : > { %v583_v40 = vsub.f32 %v495_v17, %v575_v32 }
 0x11b   : > { %v587_v41 = vsub.f32 %v499_v22, %v579_v39 }
 0x11c   : > { %591 = vst.msk [vmem:[%s1094_s5 + $0x18] sm:$0xff] %vm302_vm0, %v583_v40 }
 0x11d   : > { %595 = vst.msk [vmem:[%s1094_s5 + $0x38] sm:$0xff] %vm302_vm0, %v587_v41 }
 0x11e PF: > { %s14_s17 = sadd.s32 1, %s878_s17   ;;  %s1133_s15 = smov %s874_s16 }
 0x11f   : > { %p11_p5 = scmp.ge.s32.totalorder %s14_s17, 6   ;;  %s1134_s16 = smov %s1136_s18 }
 0x121   :  { %13 = sbr.rel (!%p11_p5) target bundleno = 2 (0x2), region = 83 }

</bundles_post_ra>
